<compile_context>
chip_gen: v7x
topology: tpu7x:2x2x1
jax: 0.10.0
libtpu: 0.0.40
codegen_flags: <defaults>
</compile_context>

<pallas_src>
import math
import functools

import jax
import jax.numpy as jnp
from jax.experimental import pallas as pl
from jax.experimental.pallas import tpu as pltpu


def make_positional_encoding_table(dim: int, max_len: int = 5000) -> jnp.ndarray:
    """Same construction as the PyTorch __init__ (float32)."""
    assert dim % 2 == 0, "PositionalEncoding requires an even embedding dim"
    position = jnp.arange(0, max_len, dtype=jnp.float32)[:, None]            # (L, 1)
    div_term = jnp.exp(jnp.arange(0, dim, 2, dtype=jnp.float32)
                       * -(math.log(10000.0) / dim))                         # (D/2,)
    pe = jnp.zeros((max_len, dim), dtype=jnp.float32)
    pe = pe.at[:, 0::2].set(jnp.sin(position * div_term))
    pe = pe.at[:, 1::2].set(jnp.cos(position * div_term))
    return pe                                                                # (L, D)


def _pos_enc_kernel(emb_ref, pe_ref, out_ref, *, scale, compute_dtype):
    # emb_ref / pe_ref / out_ref: lane-dense (tR, C) 2D tiles (batch dim squeezed).
    e = emb_ref[...].astype(compute_dtype)
    p = pe_ref[...].astype(compute_dtype)
    out_ref[...] = (e * scale + p).astype(out_ref.dtype)


def _tpu_hw_info():
    """(vmem_capacity_bytes, bf16_valu_ok) with conservative (v7x-safe) fallbacks."""
    vmem_cap = 64 * 1024 * 1024
    try:
        info = pltpu.get_tpu_info()
        vmem_cap = int(getattr(info, "vmem_capacity_bytes", vmem_cap))
    except Exception:
        pass
    bf16_ok = True
    try:
        kind = jax.devices()[0].device_kind.lower()
        if ("v5 lite" in kind) or ("v5e" in kind) or ("v5litepod" in kind):
            bf16_ok = False            # v5e VPU has no native bf16
    except Exception:
        pass
    return vmem_cap, bf16_ok


def _choose_lane_width(total: int):
    """Largest multiple of 128 (<= 2048) that divides `total`; None if not 128-aligned."""
    for c in (2048, 1024, 512, 256, 128):
        if total % c == 0:
            return c
    return None


_ROW_TILE_CANDIDATES = (4096, 2048, 1024, 512, 256, 128, 64, 32, 16, 8)


def _choose_row_tile(rows: int, cols: int, itemsize: int,
                     budget_bytes: int, want_splits: int = 1) -> int:
    """Largest sublane-aligned row tile dividing `rows` within the VMEM budget,
    preferring at least `want_splits` steps along the row axis."""
    min_sublane = max(8, 32 // itemsize)          # 8 rows f32, 16 rows bf16, ...

    def ok(t, need_splits):
        return (t % min_sublane == 0 and rows % t == 0
                and t * cols * itemsize <= budget_bytes
                and rows // t >= need_splits)

    for t in _ROW_TILE_CANDIDATES:
        if ok(t, want_splits):
            return t
    for t in _ROW_TILE_CANDIDATES:                # relax the split preference
        if ok(t, 1):
            return t
    return rows                                    # small R: take the full extent


def positional_encoding_forward(emb: jnp.ndarray, pe: jnp.ndarray,
                                dropout_p: float = 0.0) -> jnp.ndarray:
    """emb: (B, S, D); pe: (max_len, D). Returns (B, S, D) = emb*sqrt(D) + pe[:S]."""
    B, S, D = emb.shape
    scale = math.sqrt(D)
    itemsize = emb.dtype.itemsize

    # Generation-aware budgets: big tiles on 128 MiB-VMEM chips (v5e/v6e),
    # capped tiles / scoped limit on v7x (64 MiB per TensorCore).
    vmem_cap, bf16_ok = _tpu_hw_info()
    if vmem_cap >= 96 * 1024 * 1024:
        tile_budget = 8 * 1024 * 1024
        vmem_cap_limit = 64 * 1024 * 1024
    else:
        tile_budget = 4 * 1024 * 1024
        vmem_cap_limit = 32 * 1024 * 1024

    # Native bf16 math on v6e/v7x; f32 for f32 inputs and on v5e.
    if emb.dtype == jnp.bfloat16 and bf16_ok:
        compute_dtype = jnp.bfloat16
    else:
        compute_dtype = jnp.float32

    # static slice == self.pe[:, :emb.size(1)]; match emb dtype (halves HBM traffic for bf16)
    pe_slice = pe[:S, :].astype(emb.dtype)

    # Lane-dense flattening of the per-batch (S, D) slab -> (R, C), C % 128 == 0.
    total = S * D
    C = _choose_lane_width(total)
    pad = 0
    if C is None:
        padded_total = pl.cdiv(total, 128) * 128   # pad flat slab -> always lane-dense
        pad = padded_total - total
        C = _choose_lane_width(padded_total)
        total_p = padded_total
    else:
        total_p = total
    R = total_p // C

    # On v7x keep >= 2 grid steps even when B == 1 so both TensorCores get work.
    want_splits = 2 if B == 1 else 1
    tR = _choose_row_tile(R, C, itemsize, tile_budget, want_splits)
    tile_bytes = tR * C * itemsize

    emb_flat = emb.reshape(B, total)               # free row-major reshape
    pe_flat = pe_slice.reshape(total)
    if pad:
        emb_flat = jnp.pad(emb_flat, ((0, 0), (0, pad)))
        pe_flat = jnp.pad(pe_flat, (0, pad))
    emb3 = emb_flat.reshape(B, R, C)
    pe2 = pe_flat.reshape(R, C)

    kernel = functools.partial(_pos_enc_kernel, scale=scale, compute_dtype=compute_dtype)

    grid = (R // tR, B)                            # batch innermost -> pe tile stays resident

    cost = pl.CostEstimate(
        flops=2 * B * total_p,                     # one mul + one add per element
        transcendentals=0,
        bytes_accessed=(2 * B + 1) * total_p * itemsize,
    )

    # 6 double-buffered tiles (emb x2 + out x2 + pe x2) + headroom, generation-capped.
    vmem_limit = int(min(vmem_cap_limit, max(16 * 1024 * 1024, 8 * tile_bytes)))

    out = pl.pallas_call(
        kernel,
        out_shape=jax.ShapeDtypeStruct((B, R, C), emb.dtype),
        grid_spec=pltpu.PrefetchScalarGridSpec(
            num_scalar_prefetch=0,
            grid=grid,
            in_specs=[
                pl.BlockSpec((pl.Squeezed(), tR, C), lambda r, b: (b, r, 0)),  # emb tile
                pl.BlockSpec((tR, C), lambda r, b: (r, 0)),                    # pe tile (batch-invariant)
            ],
            out_specs=pl.BlockSpec((pl.Squeezed(), tR, C), lambda r, b: (b, r, 0)),
        ),
        compiler_params=pltpu.CompilerParams(
            dimension_semantics=("parallel", "parallel"),
            vmem_limit_bytes=vmem_limit,
        ),
        cost_estimate=cost,
    )(emb3, pe2)

    # TODO(synk): training-mode dropout not applied (eval/inference semantics; dropout is identity).
    del dropout_p
    return out.reshape(B, total_p)[:, :total].reshape(B, S, D)


if __name__ == "__main__":
    key = jax.random.PRNGKey(0)
    B, S, D = 2, 8, 32            # small shapes consistent with the module
    emb = jax.random.normal(key, (B, S, D), dtype=jnp.float32)

    pe = make_positional_encoding_table(D, max_len=5000)
    out = positional_encoding_forward(emb, pe, dropout_p=0.1)
    out = jax.block_until_ready(out)

    # sanity check against a pure-JAX reference (eval-mode semantics)
    ref = emb * math.sqrt(D) + pe[:S, :][None, :, :]
    assert jnp.allclose(out, ref, atol=1e-5), "mismatch vs reference"

    print("KERNEL_OK")
</pallas_src>

<mosaic_0001>
module attributes {stable_mosaic.version = 11 : i64} {
  func.func @_pos_enc_kernel(%arg0: i32, %arg1: i32, %arg2: memref<1x1x256xf32, #tpu.memory_space<vmem>>, %arg3: memref<1x256xf32, #tpu.memory_space<vmem>>, %arg4: memref<1x1x256xf32, #tpu.memory_space<vmem>>) attributes {dimension_semantics = [#tpu.dimension_semantics<parallel>, #tpu.dimension_semantics<parallel>], iteration_bounds = array<i64: 1, 2>, scalar_prefetch = 0 : i64, scratch_operands = 0 : i64, tpu.core_type = #tpu.core_type<tc>, window_params = [{transform_indices = @transform_0, window_bounds = array<i64: 1, 1, 256>}, {transform_indices = @transform_1, window_bounds = array<i64: 1, 256>}, {transform_indices = @transform_2, window_bounds = array<i64: 1, 1, 256>}]} {
    %c0 = arith.constant 0 : index
    %c0_0 = arith.constant 0 : index
    %c0_1 = arith.constant 0 : index
    %0 = vector.load %arg2[%c0, %c0_0, %c0_1] : memref<1x1x256xf32, #tpu.memory_space<vmem>>, vector<1x1x256xf32>
    %1 = vector.shape_cast %0 : vector<1x1x256xf32> to vector<1x256xf32>
    %c0_2 = arith.constant 0 : index
    %c0_3 = arith.constant 0 : index
    %2 = vector.load %arg3[%c0_2, %c0_3] : memref<1x256xf32, #tpu.memory_space<vmem>>, vector<1x256xf32>
    %cst = arith.constant 5.65685415 : f32
    %3 = vector.broadcast %cst : f32 to vector<1x256xf32>
    %4 = arith.mulf %1, %3 : vector<1x256xf32>
    %5 = arith.addf %4, %2 : vector<1x256xf32>
    %c0_4 = arith.constant 0 : index
    %c0_5 = arith.constant 0 : index
    %c0_6 = arith.constant 0 : index
    %6 = vector.load %arg4[%c0_4, %c0_5, %c0_6] : memref<1x1x256xf32, #tpu.memory_space<vmem>>, vector<1x1x256xf32>
    %7 = vector.shape_cast %6 : vector<1x1x256xf32> to vector<1x256xf32>
    %8 = vector.shape_cast %5 : vector<1x256xf32> to vector<1x1x256xf32>
    tpu.vector_store %arg4[%c0_4, %c0_5, %c0_6], %8 {strides = array<i32>} : memref<1x1x256xf32, #tpu.memory_space<vmem>>, vector<1x1x256xf32>,
    return
  }
  func.func @transform_0(%arg0: i32, %arg1: i32) -> (i32, i32, i32) {
    %c0_i32 = arith.constant 0 : i32
    %c0_i32_0 = arith.constant 0 : i32
    return %arg1, %arg0, %c0_i32 : i32, i32, i32
  }
  func.func @transform_1(%arg0: i32, %arg1: i32) -> (i32, i32) {
    %c0_i32 = arith.constant 0 : i32
    %c0_i32_0 = arith.constant 0 : i32
    return %arg0, %c0_i32 : i32, i32
  }
  func.func @transform_2(%arg0: i32, %arg1: i32) -> (i32, i32, i32) {
    %c0_i32 = arith.constant 0 : i32
    %c0_i32_0 = arith.constant 0 : i32
    return %arg1, %arg0, %c0_i32 : i32, i32, i32
  }
}

</mosaic_0001>

<bundles_post_ra>
// kernel: tpu_custom_call.1
= control target key start
LH: loop header
LB: loop body
LE: loop exit
PB: predicated region body
PF: predicated region fallthrough
CT: control target
= control target key end

     0   :  { %7 = vsyncpa [#allocation3], 0  ;;  %s706_s0 = inlined_call_operand.hbm [shape: f32[2,1,256], index: 0, kind: input, shape index: {}]   ;;  %s707_s1 = inlined_call_operand.vmem [shape: f32[1,256], index: 1, kind: input, shape index: {}]   ;;  %s708_s2 = inlined_call_operand.hbm [shape: f32[2,1,256], index: 2, kind: output, shape index: {}]  }
   0x1   :  { %9 = vsyncpa [#allocation3 + $0x1], 0 }
   0x2   :  { %10 = vsyncpa [#allocation4], 0 }
   0x3   :  { %12 = vsyncpa [#allocation4 + $0x1], 0  ;;  %s531_s9 = smov 0   ;;  %s533_s10 = smov 0  }
   0x4   :  { %s535_s11 = smov 0   ;;  %s537_s12 = smov 0  }
   0x5   :  { %s539_s13 = smov 0   ;;  %s541_s14 = smov 0  }
   0x6 LB: > { %s320_s15 = sadd.s32 4294967295, %s512_s14   ;;  %s321_s16 = sadd.s32 4294967294, %s512_s14   ;;  %s512_s14 = sphi %s541_s14, %s18_s14   ;;  %s508_s13 = sphi %s539_s13, %s724_s13   ;;  %s504_s12 = sphi %s537_s12, %s723_s12   ;;  %s500_s11 = sphi %s535_s11, %s722_s11   ;;  %s496_s10 = sphi %s533_s10, %s721_s10   ;;  %s492_s9 = sphi %s531_s9, %s720_s9  }
   0x7   : > { %s27_s17 = sadd.s32 1, %s508_s13  ;;  %s39_s18 = sadd.s32 1, %s500_s11 }
   0x8   : > { %p28_p0 = scmp.ge.s32.totalorder %s27_s17, 2  ;;  %p46_p1 = scmp.ne.s32.totalorder %s500_s11, %s496_s10 }
   0x9   : > { %p47_p2 = scmp.eq.s32.totalorder %s512_s14, 0  ;;  %p52_p3 = scmp.ne.s32.totalorder %s496_s10, %s492_s9 }
   0xa   : > { %s726_s17 = smov (%p28_p0, %s27_s17), 0  ;;  %p53_p5 = scmp.eq.s32.totalorder %s320_s15, 0 }
   0xb   : > { %p572_p4 = por %p47_p2, %p46_p1  ;;  %s34_s20 = ssub.s32 %s508_s13, %s726_s17 }
   0xc   : > { %p104_p6 = scmp.eq.s32.totalorder %s320_s15, 1  ;;  %p37_p7 = scmp.eq.s32.totalorder %s34_s20, 0 }
   0xd   : > { %p578_p8 = por %p53_p5, %p52_p3  ;;  %p110_p10 = scmp.eq.s32.totalorder %s321_s16, 1 }
   0xe   : > { %p582_p9 = por %p104_p6, %p46_p1  ;;  %p350_p13 = scmp.lt.s32.totalorder %s512_s14, 2 }
   0xf   : > { %s587_s23 = scalar_select %p37_p7, %s500_s11, %s39_s18  }
  0x10   : > { %s712_s22 = scalar_select %p582_p9, 1, 0 }
  0x11   : > { %p589_p11 = por %p110_p10, %p52_p3  ;;  %s137_s25 = sand.u32 1, %s500_s11  }
  0x12   : > { %s325_s26 = sshll.u32 %s137_s25, 1  ;;  %s336_s27 = sshll.u32 %s508_s13, 5 }
  0x13   : > { %s713_s24 = scalar_select %p589_p11, 1, 0 }
  0x14   : > { %s600_s30 = scalar_lea.hbm %s706_s0, %s336_s27  ;;  %s141_s3 = scalar_lea.vmem [#allocation2], %s325_s26 }
  0x15   : > { %s151_s4 = sshll.u32 %s141_s3, 4  ;;  %p606_p0 = pnand %p350_p13, %p572_p4  ;;  %s602_s4 = int_to_ptr.vmem [resolvable:$true] %s151_s4 }
  0x16   : > { %s138_s6 = scalar_lea.sflag [#allocation3], %s137_s25  ;;  %s400_s7 = scalar_lea.hbm %s600_s30, 32 }
  0x17   : > { %p401_p3 = scmp.ne.s32.totalorder %s600_s30, %s400_s7  ;;  %p402_p5 = pneg %p606_p0 }
  0x18   : > { %s405_s16 = scalar_lea.hbm %s706_s0, 64  ;;  %p406_p4 = scmp.lt.u32.totalorder %s600_s30, %s706_s0 }
  0x19   : > { %p403_p6 = pnand %p402_p5, %p401_p3  ;;  %p407_p10 = scmp.lt.u32.totalorder %s405_s16, %s400_s7 }
  0x1a   : > { %p409_p12 = scmp.lt.u32.totalorder %s400_s7, %s600_s30 }
  0x1b   : > { %p404_p7 = pneg %p403_p6  ;;  %p408_p13 = por %p407_p10, %p406_p4 }
  0x1d   : > { %p410_p1 = por %p409_p12, %p408_p13 }
  0x1f   : > { %p411_p2 = pnand %p410_p1, %p404_p7 }
  0x21   : > { %414 = shalt.err (!%p411_p2)
}
  0x22   : > { %s415_s20 = scalar_lea.vmem %s602_s4, 32  ;;  %s514_s25 = smov [#allocation2]  }
  0x23   : > { %p416_p3 = scmp.ne.s32.totalorder %s602_s4, %s415_s20  ;;  %s420_s26 = sshll.u32 %s514_s25, 4  ;;  %s421_s26 = int_to_ptr.vmem [resolvable:$false] %s420_s26 }
  0x24   : > { %s422_s27 = scalar_lea.vmem %s421_s26, 64  ;;  %p423_p9 = scmp.lt.s32.totalorder %s602_s4, %s421_s26 }
  0x25   : > { %p418_p6 = pnand %p416_p3, %p402_p5  ;;  %p424_p4 = scmp.lt.s32.totalorder %s422_s27, %s415_s20 }
  0x27   : > { %p419_p11 = pneg %p418_p6  ;;  %p425_p10 = por %p424_p4, %p423_p9 }
  0x29   : > { %p426_p12 = pnand %p425_p10, %p419_p11 }
  0x2b   : > { %429 = shalt.err (!%p426_p12)
}
  0x2c   : > { %345 = dma.hbm_to_vmem [thread:$0]  (!%p606_p0), %s600_s30, 32, %s602_s4, %s138_s6  }
  0x2d   : > { %p715_p1 = scmp.lt.s32.totalorder %s512_s14, 3  ;;  %p716_p2 = scmp.ge.s32.totalorder %s512_s14, 1 }
  0x2f   : > { %p157_p5 = pnand %p716_p2, %p715_p1 }
  0x30   : > { %s642_s28 = sand.u32 (!%p157_p5), 1, %s496_s10  }
  0x31   : > { %160 = sbr.rel (%p157_p5) target bundleno = 83 (0x53), region = 28  ;;  %s329_s29 = sshll.u32 (!%p157_p5), %s642_s28, 1 }
  0x32   : > { %s163_s3 = scalar_lea.sflag (!%p157_p5), [#allocation3], %s642_s28  ;;  %s166_s7 = scalar_lea.vmem (!%p157_p5), [#allocation2], %s329_s29 }
  0x38   : > { %483 = dma.done.wait (%p578_p8), %s163_s3, 32  }
  0x39   : > { %485 = vsyncadd (%p578_p8), %s163_s3, 4294967264  ;;  %v199_v0 = vlaneseq  ;;  %v195_v1 = vld [vmem:[%s166_s7] sm:$0x3]  ;;  %s190_s5 = scalar_lea.vmem [#allocation5], %s329_s29  ;;  %s337_s8 = sshll.u32 %s504_s12, 5 }
  0x3a   : > { %v196_v2 = vld [vmem:[%s707_s1] sm:$0x3]  ;;  %s221_s6 = sshll.u32 %s190_s5, 4  ;;  %v197_v3 = vmul.f32 5.656854, %v195_v1  ;;  %s659_s16 = scalar_lea.hbm %s708_s2, %s337_s8  ;;  %s654_s6 = int_to_ptr.vmem [resolvable:$true] %s221_s6 }
  0x3b   : > { %vm201_vm0 = vcmp.lt.s32.totalorder %v199_v0, 256  ;;  %s205_s18 = scalar_lea.sflag [#allocation4], %s642_s28  ;;  %s430_s19 = scalar_lea.vmem %s654_s6, 32 }
  0x3c   : > { %v198_v4 = vadd.f32 %v197_v3, %v196_v2  ;;  %p431_p8 = scmp.ne.s32.totalorder %s654_s6, %s430_s19  ;;  %p717_p9 = scmp.ne.s32.totalorder %s712_s22, 0 }
  0x3d   : > { %s515_s12 = smov [#allocation5]  }
  0x3e   : > { %203 = vst.msk [vmem:[%s190_s5] sm:$0x3] %vm201_vm0, %v198_v4  ;;  %p432_p11 = pnand %p431_p8, %p717_p9  ;;  %s434_s20 = sshll.u32 %s515_s12, 4  ;;  %s435_s20 = int_to_ptr.vmem [resolvable:$false] %s434_s20 }
  0x3f   : > { %s436_s25 = scalar_lea.vmem %s435_s20, 64  ;;  %p437_p7 = scmp.lt.s32.totalorder %s654_s6, %s435_s20 }
  0x40   : > { %p433_p0 = pneg %p432_p11  ;;  %p438_p13 = scmp.lt.s32.totalorder %s436_s25, %s430_s19 }
  0x42   : > { %p439_p3 = por %p438_p13, %p437_p7 }
  0x44   : > { %p440_p6 = pnand %p439_p3, %p433_p0 }
  0x46   : > { %443 = shalt.err (!%p440_p6)
}
  0x47   : > { %s444_s26 = scalar_lea.hbm %s659_s16, 32  ;;  %s448_s29 = scalar_lea.hbm %s708_s2, 64 }
  0x48   : > { %p445_p4 = scmp.ne.s32.totalorder %s659_s16, %s444_s26  ;;  %p449_p1 = scmp.lt.u32.totalorder %s659_s16, %s708_s2 }
  0x49   : > { %p450_p2 = scmp.lt.u32.totalorder %s448_s29, %s444_s26  ;;  %p452_p8 = scmp.lt.u32.totalorder %s444_s26, %s659_s16 }
  0x4a   : > { %p446_p10 = pnand %p445_p4, %p717_p9 }
  0x4b   : > { %p451_p5 = por %p450_p2, %p449_p1 }
  0x4c   : > { %p447_p12 = pneg %p446_p10 }
  0x4d   : > { %p453_p11 = por %p452_p8, %p451_p5 }
  0x4f   : > { %p454_p0 = pnand %p453_p11, %p447_p12 }
  0x51   : > { %457 = shalt.err (!%p454_p0)
}
  0x52   : > { %340 = dma.vmem_to_hbm [thread:$0]  (%p717_p9), %s654_s6, 32, %s659_s16, %s205_s18  }
  0x53 PF: > { %s233_s30 = sand.u32 1, %s492_s9   ;;  %p718_p7 = scmp.ne.s32.totalorder %s713_s24, 0 }
  0x54   : > { %p719_p13 = scmp.ge.s32.totalorder %s512_s14, 2  ;;  %s234_s4 = scalar_lea.sflag [#allocation4], %s233_s30 }
  0x56   : > { %p347_p3 = pnand %p719_p13, %p718_p7 }
  0x58   : > { %487 = dma.done.wait (!%p347_p3), %s234_s4, 32  }
  0x59   : > { %489 = vsyncadd (!%p347_p3), %s234_s4, 4294967264  ;;  %s18_s14 = sadd.s32 1, %s512_s14   ;;  %s720_s9 = smov %s496_s10 }
  0x5a   : > { %p15_p6 = scmp.ge.s32.totalorder %s18_s14, 4   ;;  %s721_s10 = smov %s500_s11 }
  0x5b   : > { %s722_s11 = smov %s587_s23  ;;  %s723_s12 = smov %s508_s13 }
  0x5c   : > { %s724_s13 = smov %s726_s17  ;;  %17 = sbr.rel (!%p15_p6) target bundleno = 6 (0x6), region = 76 }
  0x63   :  { %239 = vsyncpa [#allocation3], 1 }
  0x64   :  { %241 = vsyncpa [#allocation3 + $0x1], 1 }
  0x65   :  { %242 = vsyncpa [#allocation4], 1 }
  0x66   :  { %244 = vsyncpa [#allocation4 + $0x1], 1 }

</bundles_post_ra>
